<compile_context>
chip_gen: v7x
topology: tpu7x:2x2x1
jax: 0.10.0
libtpu: 0.0.40
codegen_flags: <defaults>
</compile_context>

<pallas_src>
import functools

import jax
import jax.numpy as jnp
from jax.experimental import pallas as pl
from jax.experimental.pallas import tpu as pltpu

_LANE = 128
_SUBLANE = 8
_VMEM_LIMIT = 32 * 1024 * 1024  # safe on v5e/v6e (128 MiB) and v7x (64 MiB)


def _round_up(x, m):
    return ((x + m - 1) // m) * m


def _leaky(t, slope):
    return jnp.where(t >= 0, t, slope * t)


# ---------- pass 1: tiled conv matmul + global BN sum / sum-of-squares ---------
def _conv_stats_kernel(p_ref, w_ref, y_ref, sum_ref, sq_ref):
    """p_ref: (nwin, TILE_M, Kp)  im2col patches (bf16/f32)
       w_ref: (Kp, Cp)            conv weight (resident across the grid)
       y_ref: (nwin, TILE_M, Cp)  f32 conv output tile
       sum_ref/sq_ref: (1, Cp)    f32 global accumulators (resident)."""
    @pl.when(pl.program_id(0) == 0)
    def _():
        sum_ref[...] = jnp.zeros_like(sum_ref)
        sq_ref[...] = jnp.zeros_like(sq_ref)

    w = w_ref[...]
    nwin = p_ref.shape[0]
    cp = sum_ref.shape[-1]
    s = jnp.zeros((1, cp), jnp.float32)
    sq = jnp.zeros((1, cp), jnp.float32)
    for k in range(nwin):  # static small loop: nwin in {1, 4}
        y = jnp.dot(p_ref[k], w, preferred_element_type=jnp.float32)
        y_ref[k] = y
        s = s + jnp.sum(y, axis=0, keepdims=True)
        sq = sq + jnp.sum(y * y, axis=0, keepdims=True)
    sum_ref[...] += s
    sq_ref[...] += sq


# ---------- pass 2: normalize + LeakyReLU + (optional) 2x2 max -----------------
def _bn_lrelu_pool_kernel(y_ref, scale_ref, shift_ref, o_ref, *, slope):
    scale = scale_ref[...]
    shift = shift_ref[...]
    nwin = y_ref.shape[0]
    acc = _leaky(y_ref[0] * scale + shift, slope)
    for k in range(1, nwin):  # running max: only ~2 live tiles per stage
        acc = jnp.maximum(acc, _leaky(y_ref[k] * scale + shift, slope))
    o_ref[...] = acc


def conv_layer_forward(x, weight, bias, gamma, beta, *, pool=True,
                       eps=1e-5, slope=0.1, compute_dtype=jnp.bfloat16,
                       tile_m=256):
    """ConvLayer.forward: x NCHW -> NCHW (pooled if pool=True)."""
    del bias  # train-mode BN mean subtraction exactly cancels a per-channel bias
    N, Cin, H, W = x.shape
    Cout, _, KH, KW = weight.shape
    pad = 1  # module defaults: kernel_size=3, stride=1, padding=1

    # --- im2col glue (XLA) -------------------------------------------------
    # TODO(synk): fold im2col + halo handling into the kernel to avoid the 9x
    #             HBM inflation of the patch matrices.
    xp = jnp.pad(x, ((0, 0), (0, 0), (pad, pad), (pad, pad)))
    x_nhwc = jnp.transpose(xp, (0, 2, 3, 1))                       # (N, H+2, W+2, Cin)
    patches = jnp.concatenate(
        [x_nhwc[:, ky:ky + H, kx:kx + W, :] for ky in range(KH) for kx in range(KW)],
        axis=-1)                                                   # (N, H, W, 9*Cin)
    Kdim = KH * KW * Cin

    # lane-dense padding of contracting dim and output-channel dim
    Kp = _round_up(Kdim, _LANE)
    Cp = _round_up(Cout, _LANE)

    w2 = jnp.transpose(weight, (2, 3, 1, 0)).reshape(Kdim, Cout)   # (ky,kx,ci) order
    w2 = jnp.pad(w2, ((0, Kp - Kdim), (0, Cp - Cout))).astype(compute_dtype)
    gamma_p = jnp.pad(gamma.astype(jnp.float32), (0, Cp - Cout)).reshape(1, Cp)
    beta_p = jnp.pad(beta.astype(jnp.float32), (0, Cp - Cout)).reshape(1, Cp)

    if pool:
        if H % 2 or W % 2:
            raise ValueError("pool=True requires even H and W")
        Ho, Wo = H // 2, W // 2
        M = N * Ho * Wo
        # one patch matrix per 2x2 pool-window member, stacked on a leading axis
        pw = jnp.stack([patches[:, dy::2, dx::2, :].reshape(M, Kdim)
                        for dy in (0, 1) for dx in (0, 1)], axis=0)  # (4, M, Kdim)
    else:
        Ho, Wo = H, W
        M = N * H * W
        pw = patches.reshape(1, M, Kdim)
    nwin = pw.shape[0]

    TILE_M = tile_m if M >= tile_m else _round_up(M, _SUBLANE)
    Mp = _round_up(M, TILE_M)
    grid = (Mp // TILE_M,)

    pw = jnp.pad(pw, ((0, 0), (0, Mp - M), (0, Kp - Kdim))).astype(compute_dtype)

    cp_seq = pltpu.CompilerParams(dimension_semantics=("arbitrary",),
                                  vmem_limit_bytes=_VMEM_LIMIT)
    cp_par = pltpu.CompilerParams(dimension_semantics=("parallel",),
                                  vmem_limit_bytes=_VMEM_LIMIT)

    # --- pass 1: conv matmul per tile + global BN statistics ----------------
    y_all, s_sum, s_sq = pl.pallas_call(
        _conv_stats_kernel,
        out_shape=(jax.ShapeDtypeStruct((nwin, Mp, Cp), jnp.float32),
                   jax.ShapeDtypeStruct((1, Cp), jnp.float32),
                   jax.ShapeDtypeStruct((1, Cp), jnp.float32)),
        grid_spec=pltpu.PrefetchScalarGridSpec(
            num_scalar_prefetch=0, grid=grid,
            in_specs=[pl.BlockSpec((nwin, TILE_M, Kp), lambda i: (0, i, 0)),
                      pl.BlockSpec((Kp, Cp), lambda i: (0, 0))],
            out_specs=[pl.BlockSpec((nwin, TILE_M, Cp), lambda i: (0, i, 0)),
                       pl.BlockSpec((1, Cp), lambda i: (0, 0)),
                       pl.BlockSpec((1, Cp), lambda i: (0, 0))]),
        compiler_params=cp_seq,
    )(pw, w2)

    # --- fold global stats into per-channel scale/shift (tiny XLA ops) ------
    # zero-padded rows/channels contribute 0 to sum/sumsq, so divide by real count
    m_total = float(nwin * M)
    mean = s_sum / m_total                                        # (1, Cp)
    var = jnp.maximum(s_sq / m_total - mean * mean, 0.0)          # biased variance
    scale = gamma_p * jax.lax.rsqrt(var + eps)
    shift = beta_p - mean * scale

    # --- pass 2: normalize + LeakyReLU + 2x2 max ----------------------------
    out = pl.pallas_call(
        functools.partial(_bn_lrelu_pool_kernel, slope=slope),
        out_shape=jax.ShapeDtypeStruct((Mp, Cp), jnp.float32),
        grid_spec=pltpu.PrefetchScalarGridSpec(
            num_scalar_prefetch=0, grid=grid,
            in_specs=[pl.BlockSpec((nwin, TILE_M, Cp), lambda i: (0, i, 0)),
                      pl.BlockSpec((1, Cp), lambda i: (0, 0)),
                      pl.BlockSpec((1, Cp), lambda i: (0, 0))],
            out_specs=pl.BlockSpec((TILE_M, Cp), lambda i: (i, 0))),
        compiler_params=cp_par,
    )(y_all, scale, shift)

    # TODO(synk): a consumer that accepts NHWC could skip this final transpose.
    out = out[:M, :Cout].reshape(N, Ho, Wo, Cout)
    return jnp.transpose(out, (0, 3, 1, 2))


def _reference(x, weight, bias, gamma, beta, *, pool=True, eps=1e-5, slope=0.1):
    """Pure-JAX reference mirroring the PyTorch forward (train-mode BN)."""
    y = jax.lax.conv_general_dilated(
        x, weight, window_strides=(1, 1), padding=((1, 1), (1, 1)),
        dimension_numbers=('NCHW', 'OIHW', 'NCHW'))
    y = y + bias[None, :, None, None]
    mean = jnp.mean(y, axis=(0, 2, 3), keepdims=True)
    var = jnp.mean((y - mean) ** 2, axis=(0, 2, 3), keepdims=True)
    yn = (y - mean) / jnp.sqrt(var + eps)
    yn = yn * gamma[None, :, None, None] + beta[None, :, None, None]
    act = jnp.where(yn >= 0, yn, slope * yn)
    if pool:
        N, C, H, W = act.shape
        act = act.reshape(N, C, H // 2, 2, W // 2, 2).max(axis=(3, 5))
    return act


if __name__ == "__main__":
    key = jax.random.PRNGKey(0)
    kx, kw, kb, kg, kbe = jax.random.split(key, 5)

    N, Cin, H, W, Cout = 2, 4, 16, 16, 8
    x = jax.random.normal(kx, (N, Cin, H, W), jnp.float32)
    weight = 0.1 * jax.random.normal(kw, (Cout, Cin, 3, 3), jnp.float32)
    bias = 0.05 * jax.random.normal(kb, (Cout,), jnp.float32)
    gamma = 1.0 + 0.1 * jax.random.normal(kg, (Cout,), jnp.float32)
    beta = 0.05 * jax.random.normal(kbe, (Cout,), jnp.float32)

    # pool=True (module default), bf16 MXU operands (f32 accumulate/elementwise)
    out = jax.block_until_ready(
        conv_layer_forward(x, weight, bias, gamma, beta, pool=True))
    ref = _reference(x, weight, bias, gamma, beta, pool=True)
    assert out.shape == (N, Cout, H // 2, W // 2), out.shape
    assert jnp.allclose(out, ref, atol=3e-2, rtol=3e-2), \
        float(jnp.max(jnp.abs(out - ref)))

    # f32 matmul operands: tight check of the tiled two-pass kernel logic
    out_f32 = jax.block_until_ready(
        conv_layer_forward(x, weight, bias, gamma, beta, pool=True,
                           compute_dtype=jnp.float32))
    assert jnp.allclose(out_f32, ref, atol=2e-3, rtol=2e-3), \
        float(jnp.max(jnp.abs(out_f32 - ref)))

    # pool=False path (also exercises multi-tile grid + cross-tile BN stats)
    out_np = jax.block_until_ready(
        conv_layer_forward(x, weight, bias, gamma, beta, pool=False))
    ref_np = _reference(x, weight, bias, gamma, beta, pool=False)
    assert out_np.shape == (N, Cout, H, W), out_np.shape
    assert jnp.allclose(out_np, ref_np, atol=3e-2, rtol=3e-2), \
        float(jnp.max(jnp.abs(out_np - ref_np)))

    print("KERNEL_OK")
</pallas_src>

<mosaic_0001>
module attributes {stable_mosaic.version = 11 : i64} {
  func.func @_conv_stats_kernel(%arg0: i32, %arg1: memref<4x128x128xbf16, #tpu.memory_space<vmem>>, %arg2: memref<128x128xbf16, #tpu.memory_space<vmem>>, %arg3: memref<4x128x128xf32, #tpu.memory_space<vmem>>, %arg4: memref<1x128xf32, #tpu.memory_space<vmem>>, %arg5: memref<1x128xf32, #tpu.memory_space<vmem>>) attributes {dimension_semantics = [#tpu.dimension_semantics<arbitrary>], iteration_bounds = array<i64: 1>, scalar_prefetch = 0 : i64, scratch_operands = 0 : i64, tpu.core_type = #tpu.core_type<tc>, window_params = [{transform_indices = @transform_0, window_bounds = array<i64: 4, 128, 128>}, {pipeline_mode = #tpu.pipeline_mode<synchronous>, transform_indices = @transform_1, window_bounds = array<i64: 128, 128>}, {transform_indices = @transform_2, window_bounds = array<i64: 4, 128, 128>}, {pipeline_mode = #tpu.pipeline_mode<synchronous>, transform_indices = @transform_3, window_bounds = array<i64: 1, 128>}, {pipeline_mode = #tpu.pipeline_mode<synchronous>, transform_indices = @transform_4, window_bounds = array<i64: 1, 128>}]} {
    %c0_i32 = arith.constant 0 : i32
    %0 = arith.cmpi eq, %arg0, %c0_i32 : i32
    %1 = arith.extui %0 : i1 to i32
    %c0_i32_0 = arith.constant 0 : i32
    %2 = arith.cmpi ne, %1, %c0_i32_0 : i32
    scf.if %2 {
      %cst_44 = arith.constant 0.000000e+00 : f32
      %64 = vector.broadcast %cst_44 : f32 to vector<1x128xf32>
      %c0_45 = arith.constant 0 : index
      %c0_46 = arith.constant 0 : index
      %65 = vector.load %arg4[%c0_45, %c0_46] : memref<1x128xf32, #tpu.memory_space<vmem>>, vector<1x128xf32>
      tpu.vector_store %arg4[%c0_45, %c0_46], %64 {strides = array<i32>} : memref<1x128xf32, #tpu.memory_space<vmem>>, vector<1x128xf32>,
      %cst_47 = arith.constant 0.000000e+00 : f32
      %66 = vector.broadcast %cst_47 : f32 to vector<1x128xf32>
      %c0_48 = arith.constant 0 : index
      %c0_49 = arith.constant 0 : index
      %67 = vector.load %arg5[%c0_48, %c0_49] : memref<1x128xf32, #tpu.memory_space<vmem>>, vector<1x128xf32>
      tpu.vector_store %arg5[%c0_48, %c0_49], %66 {strides = array<i32>} : memref<1x128xf32, #tpu.memory_space<vmem>>, vector<1x128xf32>,
    } else {
    }
    %c0 = arith.constant 0 : index
    %c0_1 = arith.constant 0 : index
    %3 = vector.load %arg2[%c0, %c0_1] : memref<128x128xbf16, #tpu.memory_space<vmem>>, vector<128x128xbf16>
    %cst = arith.constant 0.000000e+00 : f32
    %4 = vector.broadcast %cst : f32 to vector<1x128xf32>
    %cst_2 = arith.constant 0.000000e+00 : f32
    %5 = vector.broadcast %cst_2 : f32 to vector<1x128xf32>
    %c0_3 = arith.constant 0 : index
    %c0_4 = arith.constant 0 : index
    %c0_5 = arith.constant 0 : index
    %6 = vector.load %arg1[%c0_3, %c0_4, %c0_5] : memref<4x128x128xbf16, #tpu.memory_space<vmem>>, vector<1x128x128xbf16>
    %7 = vector.shape_cast %6 : vector<1x128x128xbf16> to vector<128x128xbf16>
    %cst_6 = arith.constant dense<0.000000e+00> : vector<128x128xf32>
    %8 = tpu.matmul %7, %3, %cst_6 {dimension_numbers = #tpu.dot_dimension_numbers<[1], [0], [0], [1], [0, 0, 1, 1], [], []>} : vector<128x128xbf16>, vector<128x128xbf16>, vector<128x128xf32> -> vector<128x128xf32>
    %c0_7 = arith.constant 0 : index
    %c0_8 = arith.constant 0 : index
    %c0_9 = arith.constant 0 : index
    %9 = vector.load %arg3[%c0_7, %c0_8, %c0_9] : memref<4x128x128xf32, #tpu.memory_space<vmem>>, vector<1x128x128xf32>
    %10 = vector.shape_cast %9 : vector<1x128x128xf32> to vector<128x128xf32>
    %11 = vector.shape_cast %8 : vector<128x128xf32> to vector<1x128x128xf32>
    tpu.vector_store %arg3[%c0_7, %c0_8, %c0_9], %11 {strides = array<i32>} : memref<4x128x128xf32, #tpu.memory_space<vmem>>, vector<1x128x128xf32>,
    %cst_10 = arith.constant dense<0.000000e+00> : vector<128xf32>
    %12 = vector.multi_reduction <add>, %8, %cst_10 [0] : vector<128x128xf32> to vector<128xf32>
    %13 = vector.shape_cast %12 : vector<128xf32> to vector<1x128xf32>
    %14 = arith.addf %4, %13 : vector<1x128xf32>
    %15 = arith.mulf %8, %8 : vector<128x128xf32>
    %cst_11 = arith.constant dense<0.000000e+00> : vector<128xf32>
    %16 = vector.multi_reduction <add>, %15, %cst_11 [0] : vector<128x128xf32> to vector<128xf32>
    %17 = vector.shape_cast %16 : vector<128xf32> to vector<1x128xf32>
    %18 = arith.addf %5, %17 : vector<1x128xf32>
    %c1 = arith.constant 1 : index
    %c0_12 = arith.constant 0 : index
    %c0_13 = arith.constant 0 : index
    %19 = vector.load %arg1[%c1, %c0_12, %c0_13] : memref<4x128x128xbf16, #tpu.memory_space<vmem>>, vector<1x128x128xbf16>
    %20 = vector.shape_cast %19 : vector<1x128x128xbf16> to vector<128x128xbf16>
    %cst_14 = arith.constant dense<0.000000e+00> : vector<128x128xf32>
    %21 = tpu.matmul %20, %3, %cst_14 {dimension_numbers = #tpu.dot_dimension_numbers<[1], [0], [0], [1], [0, 0, 1, 1], [], []>} : vector<128x128xbf16>, vector<128x128xbf16>, vector<128x128xf32> -> vector<128x128xf32>
    %c1_15 = arith.constant 1 : index
    %c0_16 = arith.constant 0 : index
    %c0_17 = arith.constant 0 : index
    %22 = vector.load %arg3[%c1_15, %c0_16, %c0_17] : memref<4x128x128xf32, #tpu.memory_space<vmem>>, vector<1x128x128xf32>
    %23 = vector.shape_cast %22 : vector<1x128x128xf32> to vector<128x128xf32>
    %24 = vector.shape_cast %21 : vector<128x128xf32> to vector<1x128x128xf32>
    tpu.vector_store %arg3[%c1_15, %c0_16, %c0_17], %24 {strides = array<i32>} : memref<4x128x128xf32, #tpu.memory_space<vmem>>, vector<1x128x128xf32>,
    %cst_18 = arith.constant dense<0.000000e+00> : vector<128xf32>
    %25 = vector.multi_reduction <add>, %21, %cst_18 [0] : vector<128x128xf32> to vector<128xf32>
    %26 = vector.shape_cast %25 : vector<128xf32> to vector<1x128xf32>
    %27 = arith.addf %14, %26 : vector<1x128xf32>
    %28 = arith.mulf %21, %21 : vector<128x128xf32>
    %cst_19 = arith.constant dense<0.000000e+00> : vector<128xf32>
    %29 = vector.multi_reduction <add>, %28, %cst_19 [0] : vector<128x128xf32> to vector<128xf32>
    %30 = vector.shape_cast %29 : vector<128xf32> to vector<1x128xf32>
    %31 = arith.addf %18, %30 : vector<1x128xf32>
    %c2 = arith.constant 2 : index
    %c0_20 = arith.constant 0 : index
    %c0_21 = arith.constant 0 : index
    %32 = vector.load %arg1[%c2, %c0_20, %c0_21] : memref<4x128x128xbf16, #tpu.memory_space<vmem>>, vector<1x128x128xbf16>
    %33 = vector.shape_cast %32 : vector<1x128x128xbf16> to vector<128x128xbf16>
    %cst_22 = arith.constant dense<0.000000e+00> : vector<128x128xf32>
    %34 = tpu.matmul %33, %3, %cst_22 {dimension_numbers = #tpu.dot_dimension_numbers<[1], [0], [0], [1], [0, 0, 1, 1], [], []>} : vector<128x128xbf16>, vector<128x128xbf16>, vector<128x128xf32> -> vector<128x128xf32>
    %c2_23 = arith.constant 2 : index
    %c0_24 = arith.constant 0 : index
    %c0_25 = arith.constant 0 : index
    %35 = vector.load %arg3[%c2_23, %c0_24, %c0_25] : memref<4x128x128xf32, #tpu.memory_space<vmem>>, vector<1x128x128xf32>
    %36 = vector.shape_cast %35 : vector<1x128x128xf32> to vector<128x128xf32>
    %37 = vector.shape_cast %34 : vector<128x128xf32> to vector<1x128x128xf32>
    tpu.vector_store %arg3[%c2_23, %c0_24, %c0_25], %37 {strides = array<i32>} : memref<4x128x128xf32, #tpu.memory_space<vmem>>, vector<1x128x128xf32>,
    %cst_26 = arith.constant dense<0.000000e+00> : vector<128xf32>
    %38 = vector.multi_reduction <add>, %34, %cst_26 [0] : vector<128x128xf32> to vector<128xf32>
    %39 = vector.shape_cast %38 : vector<128xf32> to vector<1x128xf32>
    %40 = arith.addf %27, %39 : vector<1x128xf32>
    %41 = arith.mulf %34, %34 : vector<128x128xf32>
    %cst_27 = arith.constant dense<0.000000e+00> : vector<128xf32>
    %42 = vector.multi_reduction <add>, %41, %cst_27 [0] : vector<128x128xf32> to vector<128xf32>
    %43 = vector.shape_cast %42 : vector<128xf32> to vector<1x128xf32>
    %44 = arith.addf %31, %43 : vector<1x128xf32>
    %c3 = arith.constant 3 : index
    %c0_28 = arith.constant 0 : index
    %c0_29 = arith.constant 0 : index
    %45 = vector.load %arg1[%c3, %c0_28, %c0_29] : memref<4x128x128xbf16, #tpu.memory_space<vmem>>, vector<1x128x128xbf16>
    %46 = vector.shape_cast %45 : vector<1x128x128xbf16> to vector<128x128xbf16>
    %cst_30 = arith.constant dense<0.000000e+00> : vector<128x128xf32>
    %47 = tpu.matmul %46, %3, %cst_30 {dimension_numbers = #tpu.dot_dimension_numbers<[1], [0], [0], [1], [0, 0, 1, 1], [], []>} : vector<128x128xbf16>, vector<128x128xbf16>, vector<128x128xf32> -> vector<128x128xf32>
    %c3_31 = arith.constant 3 : index
    %c0_32 = arith.constant 0 : index
    %c0_33 = arith.constant 0 : index
    %48 = vector.load %arg3[%c3_31, %c0_32, %c0_33] : memref<4x128x128xf32, #tpu.memory_space<vmem>>, vector<1x128x128xf32>
    %49 = vector.shape_cast %48 : vector<1x128x128xf32> to vector<128x128xf32>
    %50 = vector.shape_cast %47 : vector<128x128xf32> to vector<1x128x128xf32>
    tpu.vector_store %arg3[%c3_31, %c0_32, %c0_33], %50 {strides = array<i32>} : memref<4x128x128xf32, #tpu.memory_space<vmem>>, vector<1x128x128xf32>,
    %cst_34 = arith.constant dense<0.000000e+00> : vector<128xf32>
    %51 = vector.multi_reduction <add>, %47, %cst_34 [0] : vector<128x128xf32> to vector<128xf32>
    %52 = vector.shape_cast %51 : vector<128xf32> to vector<1x128xf32>
    %53 = arith.addf %40, %52 : vector<1x128xf32>
    %54 = arith.mulf %47, %47 : vector<128x128xf32>
    %cst_35 = arith.constant dense<0.000000e+00> : vector<128xf32>
    %55 = vector.multi_reduction <add>, %54, %cst_35 [0] : vector<128x128xf32> to vector<128xf32>
    %56 = vector.shape_cast %55 : vector<128xf32> to vector<1x128xf32>
    %57 = arith.addf %44, %56 : vector<1x128xf32>
    %c0_36 = arith.constant 0 : index
    %c0_37 = arith.constant 0 : index
    %58 = vector.load %arg4[%c0_36, %c0_37] : memref<1x128xf32, #tpu.memory_space<vmem>>, vector<1x128xf32>
    %59 = arith.addf %58, %53 : vector<1x128xf32>
    %c0_38 = arith.constant 0 : index
    %c0_39 = arith.constant 0 : index
    %60 = vector.load %arg4[%c0_38, %c0_39] : memref<1x128xf32, #tpu.memory_space<vmem>>, vector<1x128xf32>
    tpu.vector_store %arg4[%c0_38, %c0_39], %59 {strides = array<i32>} : memref<1x128xf32, #tpu.memory_space<vmem>>, vector<1x128xf32>,
    %c0_40 = arith.constant 0 : index
    %c0_41 = arith.constant 0 : index
    %61 = vector.load %arg5[%c0_40, %c0_41] : memref<1x128xf32, #tpu.memory_space<vmem>>, vector<1x128xf32>
    %62 = arith.addf %61, %57 : vector<1x128xf32>
    %c0_42 = arith.constant 0 : index
    %c0_43 = arith.constant 0 : index
    %63 = vector.load %arg5[%c0_42, %c0_43] : memref<1x128xf32, #tpu.memory_space<vmem>>, vector<1x128xf32>
    tpu.vector_store %arg5[%c0_42, %c0_43], %62 {strides = array<i32>} : memref<1x128xf32, #tpu.memory_space<vmem>>, vector<1x128xf32>,
    return
  }
  func.func @transform_0(%arg0: i32) -> (i32, i32, i32) {
    %c0_i32 = arith.constant 0 : i32
    %c0_i32_0 = arith.constant 0 : i32
    %c0_i32_1 = arith.constant 0 : i32
    return %c0_i32, %arg0, %c0_i32_0 : i32, i32, i32
  }
  func.func @transform_1(%arg0: i32) -> (i32, i32) {
    %c0_i32 = arith.constant 0 : i32
    %c0_i32_0 = arith.constant 0 : i32
    %c0_i32_1 = arith.constant 0 : i32
    return %c0_i32, %c0_i32_0 : i32, i32
  }
  func.func @transform_2(%arg0: i32) -> (i32, i32, i32) {
    %c0_i32 = arith.constant 0 : i32
    %c0_i32_0 = arith.constant 0 : i32
    %c0_i32_1 = arith.constant 0 : i32
    return %c0_i32, %arg0, %c0_i32_0 : i32, i32, i32
  }
  func.func @transform_3(%arg0: i32) -> (i32, i32) {
    %c0_i32 = arith.constant 0 : i32
    %c0_i32_0 = arith.constant 0 : i32
    %c0_i32_1 = arith.constant 0 : i32
    return %c0_i32, %c0_i32_0 : i32, i32
  }
  func.func @transform_4(%arg0: i32) -> (i32, i32) {
    %c0_i32 = arith.constant 0 : i32
    %c0_i32_0 = arith.constant 0 : i32
    %c0_i32_1 = arith.constant 0 : i32
    return %c0_i32, %c0_i32_0 : i32, i32
  }
}

</mosaic_0001>

<bundles_post_ra>
// kernel: tpu_custom_call.1
= control target key start
LH: loop header
LB: loop body
LE: loop exit
PB: predicated region body
PF: predicated region fallthrough
CT: control target
= control target key end

     0   :  { %10 = vsyncpa [#allocation3], 0  ;;  %s1686_s0 = inlined_call_operand.hbm [shape: bf16[4,128,128], index: 0, kind: input, shape index: {}]   ;;  %s1687_s1 = inlined_call_operand.hbm [shape: bf16[128,128], index: 1, kind: input, shape index: {}]   ;;  %s1688_s2 = inlined_call_operand.hbm [shape: f32[4,128,128], index: 2, kind: output, shape index: {0}]   ;;  %s1689_s3 = inlined_call_operand.hbm [shape: f32[1,128], index: 3, kind: output, shape index: {1}]   ;;  %s1690_s4 = inlined_call_operand.hbm [shape: f32[1,128], index: 4, kind: output, shape index: {2}]  }
   0x1   :  { %11 = vsyncpa [#allocation6], 0 }
   0x2   :  { %12 = vsyncpa [#allocation4], 0 }
   0x3   :  { %13 = vsyncpa [#allocation9], 0  ;;  %s1520_s15 = smov [#allocation2]   ;;  %s1402_s19 = scalar_lea.hbm %s1686_s0, 4096 }
   0x4   :  { %s19_s16 = sshll.u32 %s1520_s15, 4  ;;  %p1403_p0 = scmp.ne.s32.totalorder %s1686_s0, %s1402_s19  ;;  %s20_s16 = int_to_ptr.vmem [resolvable:$true] %s19_s16 }
   0x5   :  { %p1406_p1 = scmp.lt.u32.totalorder %s1402_s19, %s1686_s0 }
   0x7   :  { %p1408_p2 = pnand %p1406_p1, %p1403_p0 }
   0x9   :  { %1411 = shalt.err (!%p1408_p2)
}
   0xa   :  { %s1412_s24 = scalar_lea.vmem %s20_s16, 4096  ;;  %p1417_p4 = scmp.lt.s32.totalorder %s20_s16, %s20_s16 }
   0xb   :  { %p1413_p3 = scmp.ne.s32.totalorder %s20_s16, %s1412_s24  ;;  %p1418_p5 = scmp.lt.s32.totalorder %s1412_s24, %s1412_s24 }
   0xd   :  { %p1419_p6 = por %p1418_p5, %p1417_p4 }
   0xf   :  { %p1420_p7 = pnand %p1419_p6, %p1413_p3 }
  0x11   :  { %1423 = shalt.err (!%p1420_p7)
}
  0x12   :  { %s1521_s25 = smov 64   ;;  %s1522_s26 = smov 4  }
  0x13   :  { %25 = dma.hbm_to_vmem [thread:$0]  %s1686_s0, 4096, %s20_s16, [#allocation3], %s1521_s25, %s1521_s25, %s1522_s26  }
  0x14   :  { %s1523_s29 = smov [#allocation5]   ;;  %s1424_s7 = scalar_lea.hbm %s1687_s1, 1024 }
  0x15   :  { %s31_s30 = sshll.u32 %s1523_s29, 4  ;;  %p1425_p8 = scmp.ne.s32.totalorder %s1687_s1, %s1424_s7  ;;  %s32_s30 = int_to_ptr.vmem [resolvable:$true] %s31_s30 }
  0x16   :  { %p1428_p9 = scmp.lt.u32.totalorder %s1424_s7, %s1687_s1 }
  0x18   :  { %p1430_p10 = pnand %p1428_p9, %p1425_p8 }
  0x1a   :  { %1433 = shalt.err (!%p1430_p10)
}
  0x1b   :  { %s1434_s12 = scalar_lea.vmem %s32_s30, 1024  ;;  %p1439_p12 = scmp.lt.s32.totalorder %s32_s30, %s32_s30 }
  0x1c   :  { %p1435_p11 = scmp.ne.s32.totalorder %s32_s30, %s1434_s12  ;;  %p1440_p13 = scmp.lt.s32.totalorder %s1434_s12, %s1434_s12 }
  0x1e   :  { %p1441_p0 = por %p1440_p13, %p1439_p12 }
  0x20   :  { %p1442_p1 = pnand %p1441_p0, %p1435_p11 }
  0x22   :  { %1445 = shalt.err (!%p1442_p1)
}
  0x23   :  { %37 = dma.hbm_to_vmem [thread:$0]  %s1687_s1, 1024, %s32_s30, [#allocation6], %s1521_s25, %s1521_s25, %s1522_s26  }
  0x24   :  { %1512 = dma.done.wait [#allocation3], 4096  }
  0x25   :  { %1513 = vsyncadd [#allocation3], 4294963200 }
  0x26   :  { %1514 = dma.done.wait [#allocation6], 1024  }
  0x27   :  { %1515 = vsyncadd [#allocation6], 4294966272  ;;  %v1362_v0 = vld [vmem:[#allocation5] sm:$0xff]   ;;  %v1363_v1 = vld [vmem:[#allocation5 + $0x8] sm:$0xff]   ;;  %v1524_v40 = vmov 0.0   ;;  %s1525_s1 = smov [#allocation7]  }
  0x28   :  { %1224 = vmatprep.subr.bf16.mxu0 %v1362_v0  ;;  %1256 = vmatprep.subr.bf16.mxu1 %v1362_v0  ;;  %v1364_v2 = vld [vmem:[#allocation5 + $0x10] sm:$0xff]   ;;  %v1579_v3 = vld [vmem:[#allocation5 + $0x18] sm:$0xff]   ;;  %v1370_v4 = vld [vmem:[#allocation2] sm:$0xff]   ;;  %49 = vst [vmem:[#allocation8] sm:$0x1] %v1524_v40  ;;  %s1080_s14 = sshll.u32 %s1525_s1, 4  ;;  %s1633_s14 = int_to_ptr.vmem [resolvable:$true] %s1080_s14 }
  0x29   :  { %1225 = vmatpush3.bf16.msra.mxu0 %v1362_v0  ;;  %1257 = vmatpush3.bf16.msra.mxu1 %v1362_v0  ;;  %v1371_v5 = vld [vmem:[#allocation2 + $0x40] sm:$0xff]   ;;  %v1589_v7 = vld [vmem:[#allocation5 + $0x28] sm:$0xff]   ;;  %v1595_v8 = vld [vmem:[#allocation5 + $0x30] sm:$0xff]   ;;  %50 = vst [vmem:[#allocation10] sm:$0x1] %v1524_v40  ;;  %s1446_s15 = scalar_lea.vmem %s1633_s14, 8192  ;;  %p1451_p3 = scmp.lt.s32.totalorder %s1633_s14, %s1633_s14 }
  0x2a   :  { %1226 = vmatprep.subr.bf16.mxu0 %v1363_v1  ;;  %1258 = vmatprep.subr.bf16.mxu1 %v1363_v1  ;;  %v1583_v6 = vld [vmem:[#allocation5 + $0x20] sm:$0xff]   ;;  %v1601_v9 = vld [vmem:[#allocation5 + $0x38] sm:$0xff]   ;;  %v1372_v10 = vld [vmem:[#allocation2 + $0x8] sm:$0xff]   ;;  %p1447_p2 = scmp.ne.s32.totalorder %s1633_s14, %s1446_s15  ;;  %p1452_p4 = scmp.lt.s32.totalorder %s1446_s15, %s1446_s15 }
  0x2b   :  { %1240 = vmatprep.mubr.bf16.mxu0 %v1370_v4  ;;  %1272 = vmatprep.mubr.bf16.mxu1 %v1371_v5  ;;  %v1373_v11 = vld [vmem:[#allocation2 + $0x48] sm:$0xff]   ;;  %v1374_v12 = vld [vmem:[#allocation2 + $0x10] sm:$0xff]   ;;  %v1376_v14 = vld [vmem:[#allocation2 + $0x18] sm:$0xff]  }
  0x2c   :  { %v1375_v13 = vld [vmem:[#allocation2 + $0x50] sm:$0xff]   ;;  %v1377_v15 = vld [vmem:[#allocation2 + $0x58] sm:$0xff]   ;;  %v1378_v16 = vld [vmem:[#allocation2 + $0x20] sm:$0xff]   ;;  %p1453_p5 = por %p1452_p4, %p1451_p3 }
  0x2d   :  { %1227 = vmatpush3.bf16.msra.mxu0 %v1363_v1  ;;  %1259 = vmatpush3.bf16.msra.mxu1 %v1363_v1  ;;  %v1379_v17 = vld [vmem:[#allocation2 + $0x60] sm:$0xff]   ;;  %v1380_v18 = vld [vmem:[#allocation2 + $0x28] sm:$0xff]   ;;  %v1382_v20 = vld [vmem:[#allocation2 + $0x30] sm:$0xff]  }
  0x2e   :  { %1228 = vmatprep.subr.bf16.mxu0 %v1364_v2  ;;  %1260 = vmatprep.subr.bf16.mxu1 %v1364_v2  ;;  %v1381_v19 = vld [vmem:[#allocation2 + $0x68] sm:$0xff]   ;;  %v1383_v21 = vld [vmem:[#allocation2 + $0x70] sm:$0xff]   ;;  %v1384_v22 = vld [vmem:[#allocation2 + $0x38] sm:$0xff]   ;;  %p1454_p6 = pnand %p1453_p5, %p1447_p2 }
  0x2f   :  { %v1385_v23 = vld [vmem:[#allocation2 + $0x78] sm:$0xff]   ;;  %v1386_v24 = vld [vmem:[#allocation2 + $0x80] sm:$0xff]   ;;  %v1388_v26 = vld [vmem:[#allocation2 + $0x88] sm:$0xff]  }
  0x30   :  { %v1387_v25 = vld [vmem:[#allocation2 + $0xc0] sm:$0xff]   ;;  %v1389_v27 = vld [vmem:[#allocation2 + $0xc8] sm:$0xff]   ;;  %v1390_v28 = vld [vmem:[#allocation2 + $0x90] sm:$0xff]  }
  0x31   :  { %1229 = vmatpush3.bf16.msra.mxu0 %v1364_v2  ;;  %1261 = vmatpush3.bf16.msra.mxu1 %v1364_v2  ;;  %v1391_v29 = vld [vmem:[#allocation2 + $0xd0] sm:$0xff]   ;;  %v1392_v30 = vld [vmem:[#allocation2 + $0x98] sm:$0xff]   ;;  %v1394_v32 = vld [vmem:[#allocation2 + $0xa0] sm:$0xff]  }
  0x32   :  { %1230 = vmatprep.subr.bf16.mxu0 %v1579_v3  ;;  %1262 = vmatprep.subr.bf16.mxu1 %v1579_v3  ;;  %v1393_v31 = vld [vmem:[#allocation2 + $0xd8] sm:$0xff]   ;;  %v1395_v33 = vld [vmem:[#allocation2 + $0xe0] sm:$0xff]   ;;  %v1396_v34 = vld [vmem:[#allocation2 + $0xa8] sm:$0xff]  }
  0x33   :  { %v1397_v35 = vld [vmem:[#allocation2 + $0xe8] sm:$0xff]   ;;  %v1398_v36 = vld [vmem:[#allocation2 + $0xb0] sm:$0xff]   ;;  %v1400_v38 = vld [vmem:[#allocation2 + $0xb8] sm:$0xff]  }
  0x34   :  { %v1399_v37 = vld [vmem:[#allocation2 + $0xf0] sm:$0xff]   ;;  %v1401_v39 = vld [vmem:[#allocation2 + $0xf8] sm:$0xff]  }
  0x35   :  { %1231 = vmatpush3.bf16.msra.mxu0 %v1579_v3  ;;  %1263 = vmatpush3.bf16.msra.mxu1 %v1579_v3 }
  0x36   :  { %1232 = vmatprep.subr.bf16.mxu0 %v1583_v6  ;;  %1264 = vmatprep.subr.bf16.mxu1 %v1583_v6 }
  0x39   :  { %1233 = vmatpush3.bf16.msra.mxu0 %v1583_v6  ;;  %1265 = vmatpush3.bf16.msra.mxu1 %v1583_v6 }
  0x3a   :  { %1234 = vmatprep.subr.bf16.mxu0 %v1589_v7  ;;  %1266 = vmatprep.subr.bf16.mxu1 %v1589_v7 }
  0x3d   :  { %1235 = vmatpush3.bf16.msra.mxu0 %v1589_v7  ;;  %1267 = vmatpush3.bf16.msra.mxu1 %v1589_v7 }
  0x3e   :  { %1236 = vmatprep.subr.bf16.mxu0 %v1595_v8  ;;  %1268 = vmatprep.subr.bf16.mxu1 %v1595_v8 }
  0x41   :  { %1237 = vmatpush3.bf16.msra.mxu0 %v1595_v8  ;;  %1269 = vmatpush3.bf16.msra.mxu1 %v1595_v8 }
  0x42   :  { %1238 = vmatprep.subr.bf16.mxu0 %v1601_v9  ;;  %1270 = vmatprep.subr.bf16.mxu1 %v1601_v9 }
  0x45   :  { %1239 = vmatpush3.bf16.msra.mxu0 %v1601_v9  ;;  %1271 = vmatpush3.bf16.msra.mxu1 %v1601_v9 }
  0x46   :  { %1288 = vmatprep.subr.bf16.mxu0 %v1362_v0  ;;  %1320 = vmatprep.subr.bf16.mxu1 %v1362_v0 }
  0x48   :  { %1241 = vmatmul.mubr.bf16.vlgmr.msra.gmra.mrb[0].mxu0 %v1372_v10  ;;  %1273 = vmatmul.mubr.bf16.vlgmr.msra.gmra.mrb[0].mxu1 %v1373_v11 }
  0x49   :  { %1289 = vmatpush3.bf16.msra.mxu0 %v1362_v0  ;;  %1321 = vmatpush3.bf16.msra.mxu1 %v1362_v0 }
  0x4a   :  { %1290 = vmatprep.subr.bf16.mxu0 %v1363_v1  ;;  %1322 = vmatprep.subr.bf16.mxu1 %v1363_v1 }
  0x4b   :  { %1244 = vmatprep.mubr.bf16.mxu0 %v1374_v12  ;;  %1276 = vmatprep.mubr.bf16.mxu1 %v1375_v13 }
  0x4d   :  { %1291 = vmatpush3.bf16.msra.mxu0 %v1363_v1  ;;  %1323 = vmatpush3.bf16.msra.mxu1 %v1363_v1 }
  0x4e   :  { %1292 = vmatprep.subr.bf16.mxu0 %v1364_v2  ;;  %1324 = vmatprep.subr.bf16.mxu1 %v1364_v2 }
  0x50   :  { %1245 = vmatmul.mubr.bf16.gmra.mrb[4].mxu0 %v1376_v14  ;;  %1277 = vmatmul.mubr.bf16.gmra.mrb[4].mxu1 %v1377_v15 }
  0x51   :  { %1293 = vmatpush3.bf16.msra.mxu0 %v1364_v2  ;;  %1325 = vmatpush3.bf16.msra.mxu1 %v1364_v2 }
  0x52   :  { %1294 = vmatprep.subr.bf16.mxu0 %v1579_v3  ;;  %1326 = vmatprep.subr.bf16.mxu1 %v1579_v3 }
  0x53   :  { %1248 = vmatprep.mubr.bf16.mxu0 %v1378_v16  ;;  %1280 = vmatprep.mubr.bf16.mxu1 %v1379_v17 }
  0x55   :  { %1295 = vmatpush3.bf16.msra.mxu0 %v1579_v3  ;;  %1327 = vmatpush3.bf16.msra.mxu1 %v1579_v3 }
  0x56   :  { %1296 = vmatprep.subr.bf16.mxu0 %v1583_v6  ;;  %1328 = vmatprep.subr.bf16.mxu1 %v1583_v6 }
  0x58   :  { %1249 = vmatmul.mubr.bf16.gmra.mrb[8].mxu0 %v1380_v18  ;;  %1281 = vmatmul.mubr.bf16.gmra.mrb[8].mxu1 %v1381_v19 }
  0x59   :  { %1297 = vmatpush3.bf16.msra.mxu0 %v1583_v6  ;;  %1329 = vmatpush3.bf16.msra.mxu1 %v1583_v6 }
  0x5a   :  { %1298 = vmatprep.subr.bf16.mxu0 %v1589_v7  ;;  %1330 = vmatprep.subr.bf16.mxu1 %v1589_v7 }
  0x5b   :  { %1252 = vmatprep.mubr.bf16.mxu0 %v1382_v20  ;;  %1284 = vmatprep.mubr.bf16.mxu1 %v1383_v21 }
  0x5d   :  { %1299 = vmatpush3.bf16.msra.mxu0 %v1589_v7  ;;  %1331 = vmatpush3.bf16.msra.mxu1 %v1589_v7 }
  0x5e   :  { %1300 = vmatprep.subr.bf16.mxu0 %v1595_v8  ;;  %1332 = vmatprep.subr.bf16.mxu1 %v1595_v8 }
  0x60   :  { %1253 = vmatmul.mubr.bf16.gmra.mrb[12].mxu0 %v1384_v22  ;;  %1285 = vmatmul.mubr.bf16.gmra.mrb[12].mxu1 %v1385_v23 }
  0x61   :  { %1301 = vmatpush3.bf16.msra.mxu0 %v1595_v8  ;;  %1333 = vmatpush3.bf16.msra.mxu1 %v1595_v8 }
  0x62   :  { %1302 = vmatprep.subr.bf16.mxu0 %v1601_v9  ;;  %1334 = vmatprep.subr.bf16.mxu1 %v1601_v9 }
  0x63   :  { %1304 = vmatprep.mubr.bf16.mxu0 %v1386_v24  ;;  %1336 = vmatprep.mubr.bf16.mxu1 %v1387_v25 }
  0x65   :  { %1303 = vmatpush3.bf16.msra.mxu0 %v1601_v9  ;;  %1335 = vmatpush3.bf16.msra.mxu1 %v1601_v9 }
  0x68   :  { %1305 = vmatmul.mubr.bf16.vlgmr.msra.gmra.mrb[16].mxu0 %v1388_v26  ;;  %1337 = vmatmul.mubr.bf16.vlgmr.msra.gmra.mrb[16].mxu1 %v1389_v27 }
  0x69   :  { %1308 = vmatprep.mubr.bf16.mxu0 %v1390_v28  ;;  %1340 = vmatprep.mubr.bf16.mxu1 %v1391_v29 }
  0x70   :  { %1309 = vmatmul.mubr.bf16.gmra.mrb[20].mxu0 %v1392_v30  ;;  %1341 = vmatmul.mubr.bf16.gmra.mrb[20].mxu1 %v1393_v31 }
  0x71   :  { %1312 = vmatprep.mubr.bf16.mxu0 %v1394_v32  ;;  %1344 = vmatprep.mubr.bf16.mxu1 %v1395_v33 }
  0x78   :  { %1313 = vmatmul.mubr.bf16.gmra.mrb[24].mxu0 %v1396_v34  ;;  %1345 = vmatmul.mubr.bf16.gmra.mrb[24].mxu1 %v1397_v35 }
  0x79   :  { %1316 = vmatprep.mubr.bf16.mxu0 %v1398_v36  ;;  %1348 = vmatprep.mubr.bf16.mxu1 %v1399_v37 }
  0x80   :  { %1317 = vmatmul.mubr.bf16.gmra.mrb[28].mxu0 %v1400_v38  ;;  %1349 = vmatmul.mubr.bf16.gmra.mrb[28].mxu1 %v1401_v39 }
 0x11b   :  { %v1242_v41 = vpop.f32.mrb[0].mxu0  ;;  %v1274_v42 = vpop.f32.mrb[0].mxu1 }
 0x11c   :  { %278 = vst [vmem:[#allocation7 + $0x10] sm:$0xff] %v1242_v41  ;;  %517 = vst [vmem:[#allocation7 + $0x90] sm:$0xff] %v1274_v42  ;;  %v213_v43 = vpop.f32.mrb[1].mxu0  ;;  %v451_v44 = vpop.f32.mrb[1].mxu1  ;;  %v316_v55 = vmul.f32 %v1242_v41, %v1242_v41  ;;  %v555_v56 = vmul.f32 %v1274_v42, %v1274_v42 }
 0x11d   :  { %276 = vst [vmem:[#allocation7] sm:$0xff] %v213_v43  ;;  %515 = vst [vmem:[#allocation7 + $0x80] sm:$0xff] %v451_v44  ;;  %v553_v45 = vmul.f32 %v451_v44, %v451_v44  ;;  %v1243_v46 = vpop.f32.mrb[2].mxu0  ;;  %v1275_v47 = vpop.f32.mrb[2].mxu1  ;;  %v314_v48 = vmul.f32 %v213_v43, %v213_v43 }
 0x11e   :  { %279 = vst [vmem:[#allocation7 + $0x18] sm:$0xff] %v1243_v46  ;;  %518 = vst [vmem:[#allocation7 + $0x98] sm:$0xff] %v1275_v47  ;;  %v216_v49 = vpop.f32.mrb[3].mxu0  ;;  %v454_v50 = vpop.f32.mrb[3].mxu1  ;;  %v317_v61 = vmul.f32 %v1243_v46, %v1243_v46  ;;  %v556_v4 = vmul.f32 %v1275_v47, %v1275_v47 }
 0x11f   :  { %277 = vst [vmem:[#allocation7 + $0x8] sm:$0xff] %v216_v49  ;;  %v292_v51 = vadd.f32 %v216_v49, %v213_v43  ;;  %v315_v52 = vmul.f32 %v216_v49, %v216_v49  ;;  %516 = vst [vmem:[#allocation7 + $0x88] sm:$0xff] %v454_v50  ;;  %v531_v53 = vadd.f32 %v454_v50, %v451_v44 }
 0x120   :  { %v554_v54 = vmul.f32 %v454_v50, %v454_v50 }
 0x121   :  { %v293_v57 = vadd.f32 %v1242_v41, %v292_v51  ;;  %v330_v58 = vadd.f32 %v315_v52, %v314_v48  ;;  %v532_v59 = vadd.f32 %v1274_v42, %v531_v53 }
 0x122   :  { %v569_v60 = vadd.f32 %v554_v54, %v553_v45 }
 0x123   :  { %v331_v62 = vadd.f32 %v330_v58, %v316_v55  ;;  %v1246_v0 = vpop.f32.mrb[4].mxu0  ;;  %v1278_v1 = vpop.f32.mrb[4].mxu1  ;;  %v294_v2 = vadd.f32 %v1243_v46, %v293_v57  ;;  %v533_v3 = vadd.f32 %v1275_v47, %v532_v59 }
 0x124   :  { %v570_v63 = vadd.f32 %v569_v60, %v555_v56  ;;  %282 = vst [vmem:[#allocation7 + $0x30] sm:$0xff] %v1246_v0  ;;  %521 = vst [vmem:[#allocation7 + $0xb0] sm:$0xff] %v1278_v1  ;;  %v229_v5 = vpop.f32.mrb[5].mxu0  ;;  %v467_v6 = vpop.f32.mrb[5].mxu1  ;;  %v320_v23 = vmul.f32 %v1246_v0, %v1246_v0  ;;  %v559_v27 = vmul.f32 %v1278_v1, %v1278_v1 }
 0x125   :  { %280 = vst [vmem:[#allocation7 + $0x20] sm:$0xff] %v229_v5  ;;  %v295_v7 = vadd.f32 %v294_v2, %v229_v5  ;;  %v318_v8 = vmul.f32 %v229_v5, %v229_v5  ;;  %v332_v9 = vadd.f32 %v331_v62, %v317_v61  ;;  %519 = vst [vmem:[#allocation7 + $0xa0] sm:$0xff] %v467_v6  ;;  %v1247_v11 = vpop.f32.mrb[6].mxu0  ;;  %v1279_v12 = vpop.f32.mrb[6].mxu1 }
 0x126   :  { %v534_v10 = vadd.f32 %v533_v3, %v467_v6  ;;  %v557_v13 = vmul.f32 %v467_v6, %v467_v6  ;;  %v571_v14 = vadd.f32 %v570_v63, %v556_v4  ;;  %283 = vst [vmem:[#allocation7 + $0x38] sm:$0xff] %v1247_v11  ;;  %522 = vst [vmem:[#allocation7 + $0xb8] sm:$0xff] %v1279_v12  ;;  %v232_v15 = vpop.f32.mrb[7].mxu0  ;;  %v470_v16 = vpop.f32.mrb[7].mxu1 }
 0x127   :  { %v333_v17 = vadd.f32 %v332_v9, %v318_v8  ;;  %281 = vst [vmem:[#allocation7 + $0x28] sm:$0xff] %v232_v15  ;;  %v296_v18 = vadd.f32 %v295_v7, %v232_v15  ;;  %v319_v19 = vmul.f32 %v232_v15, %v232_v15  ;;  %520 = vst [vmem:[#allocation7 + $0xa8] sm:$0xff] %v470_v16 }
 0x128   :  { %v535_v20 = vadd.f32 %v534_v10, %v470_v16  ;;  %v572_v21 = vadd.f32 %v571_v14, %v557_v13  ;;  %v558_v22 = vmul.f32 %v470_v16, %v470_v16  ;;  %v321_v29 = vmul.f32 %v1247_v11, %v1247_v11 }
 0x129   :  { %v297_v24 = vadd.f32 %v1246_v0, %v296_v18  ;;  %v334_v25 = vadd.f32 %v333_v17, %v319_v19  ;;  %v560_v35 = vmul.f32 %v1279_v12, %v1279_v12 }
 0x12a   :  { %v536_v26 = vadd.f32 %v1278_v1, %v535_v20  ;;  %v573_v28 = vadd.f32 %v572_v21, %v558_v22 }
 0x12b   :  { %v335_v30 = vadd.f32 %v334_v25, %v320_v23  ;;  %v1250_v31 = vpop.f32.mrb[8].mxu0  ;;  %v1282_v32 = vpop.f32.mrb[8].mxu1  ;;  %v298_v33 = vadd.f32 %v1247_v11, %v297_v24 }
 0x12c   :  { %v537_v34 = vadd.f32 %v1279_v12, %v536_v26  ;;  %v574_v36 = vadd.f32 %v573_v28, %v559_v27  ;;  %286 = vst [vmem:[#allocation7 + $0x50] sm:$0xff] %v1250_v31  ;;  %525 = vst [vmem:[#allocation7 + $0xd0] sm:$0xff] %v1282_v32  ;;  %v245_v37 = vpop.f32.mrb[9].mxu0  ;;  %v483_v38 = vpop.f32.mrb[9].mxu1  ;;  %v324_v55 = vmul.f32 %v1250_v31, %v1250_v31 }
 0x12d   :  { %284 = vst [vmem:[#allocation7 + $0x40] sm:$0xff] %v245_v37  ;;  %v299_v39 = vadd.f32 %v298_v33, %v245_v37  ;;  %v322_v40 = vmul.f32 %v245_v37, %v245_v37  ;;  %v336_v41 = vadd.f32 %v335_v30, %v321_v29  ;;  %523 = vst [vmem:[#allocation7 + $0xc0] sm:$0xff] %v483_v38  ;;  %v1251_v43 = vpop.f32.mrb[10].mxu0  ;;  %v1283_v44 = vpop.f32.mrb[10].mxu1 }
 0x12e   :  { %v538_v42 = vadd.f32 %v537_v34, %v483_v38  ;;  %v561_v45 = vmul.f32 %v483_v38, %v483_v38  ;;  %v575_v46 = vadd.f32 %v574_v36, %v560_v35  ;;  %287 = vst [vmem:[#allocation7 + $0x58] sm:$0xff] %v1251_v43  ;;  %526 = vst [vmem:[#allocation7 + $0xd8] sm:$0xff] %v1283_v44  ;;  %v248_v47 = vpop.f32.mrb[11].mxu0  ;;  %v486_v48 = vpop.f32.mrb[11].mxu1 }
 0x12f   :  { %v337_v49 = vadd.f32 %v336_v41, %v322_v40  ;;  %285 = vst [vmem:[#allocation7 + $0x48] sm:$0xff] %v248_v47  ;;  %v300_v50 = vadd.f32 %v299_v39, %v248_v47  ;;  %v323_v51 = vmul.f32 %v248_v47, %v248_v47  ;;  %524 = vst [vmem:[#allocation7 + $0xc8] sm:$0xff] %v486_v48 }
 0x130   :  { %v539_v52 = vadd.f32 %v538_v42, %v486_v48  ;;  %v576_v53 = vadd.f32 %v575_v46, %v561_v45  ;;  %v562_v54 = vmul.f32 %v486_v48, %v486_v48  ;;  %v563_v59 = vmul.f32 %v1282_v32, %v1282_v32 }
 0x131   :  { %v301_v56 = vadd.f32 %v1250_v31, %v300_v50  ;;  %v338_v57 = vadd.f32 %v337_v49, %v323_v51  ;;  %v325_v61 = vmul.f32 %v1251_v43, %v1251_v43  ;;  %v564_v3 = vmul.f32 %v1283_v44, %v1283_v44 }
 0x132   :  { %v540_v58 = vadd.f32 %v1282_v32, %v539_v52  ;;  %v577_v60 = vadd.f32 %v576_v53, %v562_v54 }
 0x133   :  { %v339_v62 = vadd.f32 %v338_v57, %v324_v55  ;;  %v1254_v63 = vpop.f32.mrb[12].mxu0  ;;  %v1286_v0 = vpop.f32.mrb[12].mxu1  ;;  %v302_v1 = vadd.f32 %v1251_v43, %v301_v56 }
 0x134   :  { %v541_v2 = vadd.f32 %v1283_v44, %v540_v58  ;;  %v578_v4 = vadd.f32 %v577_v60, %v563_v59  ;;  %290 = vst [vmem:[#allocation7 + $0x70] sm:$0xff] %v1254_v63  ;;  %529 = vst [vmem:[#allocation7 + $0xf0] sm:$0xff] %v1286_v0  ;;  %v261_v5 = vpop.f32.mrb[13].mxu0  ;;  %v499_v6 = vpop.f32.mrb[13].mxu1  ;;  %v328_v23 = vmul.f32 %v1254_v63, %v1254_v63 }
 0x135   :  { %288 = vst [vmem:[#allocation7 + $0x60] sm:$0xff] %v261_v5  ;;  %v303_v7 = vadd.f32 %v302_v1, %v261_v5  ;;  %v326_v8 = vmul.f32 %v261_v5, %v261_v5  ;;  %v340_v9 = vadd.f32 %v339_v62, %v325_v61  ;;  %527 = vst [vmem:[#allocation7 + $0xe0] sm:$0xff] %v499_v6  ;;  %v1255_v11 = vpop.f32.mrb[14].mxu0  ;;  %v1287_v12 = vpop.f32.mrb[14].mxu1 }
 0x136   :  { %v542_v10 = vadd.f32 %v541_v2, %v499_v6  ;;  %v565_v13 = vmul.f32 %v499_v6, %v499_v6  ;;  %v579_v14 = vadd.f32 %v578_v4, %v564_v3  ;;  %291 = vst [vmem:[#allocation7 + $0x78] sm:$0xff] %v1255_v11  ;;  %530 = vst [vmem:[#allocation7 + $0xf8] sm:$0xff] %v1287_v12  ;;  %v264_v15 = vpop.f32.mrb[15].mxu0  ;;  %v502_v16 = vpop.f32.mrb[15].mxu1 }
 0x137   :  { %v341_v17 = vadd.f32 %v340_v9, %v326_v8  ;;  %289 = vst [vmem:[#allocation7 + $0x68] sm:$0xff] %v264_v15  ;;  %v304_v18 = vadd.f32 %v303_v7, %v264_v15  ;;  %v327_v19 = vmul.f32 %v264_v15, %v264_v15  ;;  %528 = vst [vmem:[#allocation7 + $0xe8] sm:$0xff] %v502_v16 }
 0x138   :  { %v543_v20 = vadd.f32 %v542_v10, %v502_v16  ;;  %v580_v21 = vadd.f32 %v579_v14, %v565_v13  ;;  %v566_v22 = vmul.f32 %v502_v16, %v502_v16  ;;  %v567_v27 = vmul.f32 %v1286_v0, %v1286_v0 }
 0x139   :  { %v305_v24 = vadd.f32 %v1254_v63, %v304_v18  ;;  %v342_v25 = vadd.f32 %v341_v17, %v327_v19  ;;  %v329_v29 = vmul.f32 %v1255_v11, %v1255_v11  ;;  %v568_v35 = vmul.f32 %v1287_v12, %v1287_v12 }
 0x13a   :  { %v544_v26 = vadd.f32 %v1286_v0, %v543_v20  ;;  %v581_v28 = vadd.f32 %v580_v21, %v566_v22 }
 0x13b   :  { %v306_v30 = vadd.f32 %v1255_v11, %v305_v24  ;;  %v343_v31 = vadd.f32 %v342_v25, %v328_v23  ;;  %v1306_v33 = vpop.f32.mrb[16].mxu0  ;;  %v1338_v34 = vpop.f32.mrb[16].mxu1 }
 0x13c   :  { %v545_v32 = vadd.f32 %v1287_v12, %v544_v26  ;;  %v582_v36 = vadd.f32 %v581_v28, %v567_v27  ;;  %756 = vst [vmem:[#allocation7 + $0x110] sm:$0xff] %v1306_v33  ;;  %995 = vst [vmem:[#allocation7 + $0x190] sm:$0xff] %v1338_v34  ;;  %v690_v37 = vpop.f32.mrb[17].mxu0  ;;  %v929_v38 = vpop.f32.mrb[17].mxu1  ;;  %v794_v42 = vmul.f32 %v1306_v33, %v1306_v33 }
 0x13d   :  { %v307_v39 = vrot.slane %v306_v30, 4  ;;  %v344_v40 = vadd.f32 %v343_v31, %v329_v29  ;;  %754 = vst [vmem:[#allocation7 + $0x100] sm:$0xff] %v690_v37  ;;  %993 = vst [vmem:[#allocation7 + $0x180] sm:$0xff] %v929_v38  ;;  %v1307_v43 = vpop.f32.mrb[18].mxu0  ;;  %v1339_v44 = vpop.f32.mrb[18].mxu1  ;;  %v1033_v46 = vmul.f32 %v1338_v34, %v1338_v34  ;;  %v792_v47 = vmul.f32 %v690_v37, %v690_v37 }
 0x13e   :  { %v546_v41 = vrot.slane %v545_v32, 4  ;;  %v583_v45 = vadd.f32 %v582_v36, %v568_v35  ;;  %v1031_v48 = vmul.f32 %v929_v38, %v929_v38  ;;  %757 = vst [vmem:[#allocation7 + $0x118] sm:$0xff] %v1307_v43  ;;  %996 = vst [vmem:[#allocation7 + $0x198] sm:$0xff] %v1339_v44  ;;  %v693_v49 = vpop.f32.mrb[19].mxu0  ;;  %v932_v50 = vpop.f32.mrb[19].mxu1  ;;  %v795_v10 = vmul.f32 %v1307_v43, %v1307_v43 }
 0x13f   :  { %v308_v51 = vadd.f32 %v307_v39, %v306_v30  ;;  %v345_v52 = vrot.slane %v344_v40, 4  ;;  %755 = vst [vmem:[#allocation7 + $0x108] sm:$0xff] %v693_v49  ;;  %v770_v54 = vadd.f32 %v693_v49, %v690_v37  ;;  %994 = vst [vmem:[#allocation7 + $0x188] sm:$0xff] %v932_v50  ;;  %v793_v56 = vmul.f32 %v693_v49, %v693_v49 }
 0x140   :  { %v547_v53 = vadd.f32 %v546_v41, %v545_v32  ;;  %v584_v55 = vrot.slane %v583_v45, 4  ;;  %v1009_v57 = vadd.f32 %v932_v50, %v929_v38  ;;  %v1032_v58 = vmul.f32 %v932_v50, %v932_v50 }
 0x141   :  { %v309_v59 = vrot.slane %v308_v51, 2  ;;  %v346_v60 = vadd.f32 %v345_v52, %v344_v40  ;;  %v771_v62 = vadd.f32 %v1306_v33, %v770_v54  ;;  %v808_v0 = vadd.f32 %v793_v56, %v792_v47 }
 0x142   :  { %v548_v61 = vrot.slane %v547_v53, 2  ;;  %v585_v63 = vadd.f32 %v584_v55, %v583_v45  ;;  %v1010_v1 = vadd.f32 %v1338_v34, %v1009_v57  ;;  %v1047_v2 = vadd.f32 %v1032_v58, %v1031_v48 }
 0x143   :  { %v310_v3 = vadd.f32 %v309_v59, %v308_v51  ;;  %v347_v4 = vrot.slane %v346_v60, 2  ;;  %v1310_v6 = vpop.f32.mrb[20].mxu0  ;;  %v1342_v7 = vpop.f32.mrb[20].mxu1  ;;  %v772_v8 = vadd.f32 %v1307_v43, %v771_v62  ;;  %v809_v11 = vadd.f32 %v808_v0, %v794_v42 }
 0x144   :  { %v549_v5 = vadd.f32 %v548_v61, %v547_v53  ;;  %v586_v9 = vrot.slane %v585_v63, 2  ;;  %v1048_v12 = vadd.f32 %v1047_v2, %v1033_v46  ;;  %760 = vst [vmem:[#allocation7 + $0x130] sm:$0xff] %v1310_v6  ;;  %999 = vst [vmem:[#allocation7 + $0x1b0] sm:$0xff] %v1342_v7  ;;  %v706_v13 = vpop.f32.mrb[21].mxu0  ;;  %v945_v14 = vpop.f32.mrb[21].mxu1  ;;  %v1034_v18 = vmul.f32 %v1339_v44, %v1339_v44 }
 0x145   :  { %v311_v15 = vrot.slane %v310_v3, 1  ;;  %v348_v16 = vadd.f32 %v347_v4, %v346_v60  ;;  %758 = vst [vmem:[#allocation7 + $0x120] sm:$0xff] %v706_v13  ;;  %997 = vst [vmem:[#allocation7 + $0x1a0] sm:$0xff] %v945_v14  ;;  %v1311_v19 = vpop.f32.mrb[22].mxu0  ;;  %v1343_v20 = vpop.f32.mrb[22].mxu1  ;;  %v773_v22 = vadd.f32 %v772_v8, %v706_v13  ;;  %v796_v23 = vmul.f32 %v706_v13, %v706_v13 }
 0x146   :  { %v550_v17 = vrot.slane %v549_v5, 1  ;;  %v587_v21 = vadd.f32 %v586_v9, %v585_v63  ;;  %v810_v24 = vadd.f32 %v809_v11, %v795_v10  ;;  %761 = vst [vmem:[#allocation7 + $0x138] sm:$0xff] %v1311_v19  ;;  %1000 = vst [vmem:[#allocation7 + $0x1b8] sm:$0xff] %v1343_v20  ;;  %v709_v25 = vpop.f32.mrb[23].mxu0  ;;  %v948_v26 = vpop.f32.mrb[23].mxu1  ;;  %v1011_v30 = vadd.f32 %v1339_v44, %v1010_v1 }
 0x147   :  { %v312_v27 = vadd.f32 %v311_v15, %v310_v3  ;;  %v349_v28 = vrot.slane %v348_v16, 1  ;;  %759 = vst [vmem:[#allocation7 + $0x128] sm:$0xff] %v709_v25  ;;  %998 = vst [vmem:[#allocation7 + $0x1a8] sm:$0xff] %v948_v26  ;;  %v1035_v33 = vmul.f32 %v945_v14, %v945_v14  ;;  %v1049_v34 = vadd.f32 %v1048_v12, %v1034_v18 }
 0x148   :  { %v551_v29 = vadd.f32 %v550_v17, %v549_v5  ;;  %v588_v31 = vrot.slane %v587_v21, 1  ;;  %v811_v32 = vadd.f32 %v810_v24, %v796_v23  ;;  %v1012_v35 = vadd.f32 %v1011_v30, %v945_v14 }
 0x149   :  { %v1050_v36 = vadd.f32 %v1049_v34, %v1035_v33  ;;  %v774_v37 = vadd.f32 %v773_v22, %v709_v25  ;;  %v797_v38 = vmul.f32 %v709_v25, %v709_v25  ;;  %v798_v39 = vmul.f32 %v1310_v6, %v1310_v6 }
 0x14a   :  { %v1013_v40 = vadd.f32 %v1012_v35, %v948_v26  ;;  %v1036_v41 = vmul.f32 %v948_v26, %v948_v26  ;;  %v1629_v45 = vadd.f32 %v551_v29, %v312_v27  ;;  %v350_v46 = vadd.f32 %v349_v28, %v348_v16 }
 0x14b   :  { %v1314_v42 = vpop.f32.mrb[24].mxu0  ;;  %v1346_v43 = vpop.f32.mrb[24].mxu1  ;;  %v589_v47 = vadd.f32 %v588_v31, %v587_v21  ;;  %v775_v44 = vadd.f32 %v1310_v6, %v774_v37  ;;  %v812_v48 = vadd.f32 %v811_v32, %v797_v38  ;;  %v1037_v51 = vmul.f32 %v1342_v7, %v1342_v7 }
 0x14c   :  { %764 = vst [vmem:[#allocation7 + $0x150] sm:$0xff] %v1314_v42  ;;  %1003 = vst [vmem:[#allocation7 + $0x1d0] sm:$0xff] %v1346_v43  ;;  %v722_v49 = vpop.f32.mrb[25].mxu0  ;;  %v961_v50 = vpop.f32.mrb[25].mxu1  ;;  %v1014_v52 = vadd.f32 %v1342_v7, %v1013_v40  ;;  %v1051_v53 = vadd.f32 %v1050_v36, %v1036_v41  ;;  %v799_v56 = vmul.f32 %v1311_v19, %v1311_v19 }
 0x14d   :  { %762 = vst [vmem:[#allocation7 + $0x140] sm:$0xff] %v722_v49  ;;  %1001 = vst [vmem:[#allocation7 + $0x1c0] sm:$0xff] %v961_v50  ;;  %v1315_v54 = vpop.f32.mrb[26].mxu0  ;;  %v1347_v55 = vpop.f32.mrb[26].mxu1  ;;  %v813_v57 = vadd.f32 %v812_v48, %v798_v39  ;;  %v776_v58 = vadd.f32 %v1311_v19, %v775_v44  ;;  %v800_v59 = vmul.f32 %v722_v49, %v722_v49 }
 0x14e   :  { %765 = vst [vmem:[#allocation7 + $0x158] sm:$0xff] %v1315_v54  ;;  %1004 = vst [vmem:[#allocation7 + $0x1d8] sm:$0xff] %v1347_v55  ;;  %v725_v60 = vpop.f32.mrb[27].mxu0  ;;  %v964_v61 = vpop.f32.mrb[27].mxu1  ;;  %v1038_v62 = vmul.f32 %v1343_v20, %v1343_v20  ;;  %v1052_v63 = vadd.f32 %v1051_v53, %v1037_v51  ;;  %v1015_v0 = vadd.f32 %v1343_v20, %v1014_v52 }
 0x14f   :  { %v1039_v1 = vmul.f32 %v961_v50, %v961_v50  ;;  %763 = vst [vmem:[#allocation7 + $0x148] sm:$0xff] %v725_v60  ;;  %1002 = vst [vmem:[#allocation7 + $0x1c8] sm:$0xff] %v964_v61  ;;  %v777_v2 = vadd.f32 %v776_v58, %v722_v49  ;;  %v814_v3 = vadd.f32 %v813_v57, %v799_v56 }
 0x150   :  { %v801_v4 = vmul.f32 %v725_v60, %v725_v60  ;;  %v1631_v5 = vadd.f32 %v589_v47, %v350_v46  ;;  %v1016_v6 = vadd.f32 %v1015_v0, %v961_v50  ;;  %v1053_v7 = vadd.f32 %v1052_v63, %v1038_v62 }
 0x151   :  { %v1040_v8 = vmul.f32 %v964_v61, %v964_v61  ;;  %v815_v9 = vadd.f32 %v814_v3, %v800_v59  ;;  %v778_v10 = vadd.f32 %v777_v2, %v725_v60  ;;  %v802_v15 = vmul.f32 %v1314_v42, %v1314_v42 }
 0x152   :  { %v1054_v11 = vadd.f32 %v1053_v7, %v1039_v1  ;;  %v1017_v12 = vadd.f32 %v1016_v6, %v964_v61  ;;  %v1041_v20 = vmul.f32 %v1346_v43, %v1346_v43  ;;  %v803_v25 = vmul.f32 %v1315_v54, %v1315_v54 }
 0x153   :  { %v1318_v13 = vpop.f32.mrb[28].mxu0  ;;  %v1350_v14 = vpop.f32.mrb[28].mxu1  ;;  %v779_v16 = vadd.f32 %v1314_v42, %v778_v10  ;;  %v816_v17 = vadd.f32 %v815_v9, %v801_v4  ;;  %v1042_v31 = vmul.f32 %v1347_v55, %v1347_v55 }
 0x154   :  { %768 = vst [vmem:[#allocation7 + $0x170] sm:$0xff] %v1318_v13  ;;  %1007 = vst [vmem:[#allocation7 + $0x1f0] sm:$0xff] %v1350_v14  ;;  %v738_v18 = vpop.f32.mrb[29].mxu0  ;;  %v977_v19 = vpop.f32.mrb[29].mxu1  ;;  %v1018_v21 = vadd.f32 %v1346_v43, %v1017_v12  ;;  %v1055_v22 = vadd.f32 %v1054_v11, %v1040_v8 }
 0x155   :  { %766 = vst [vmem:[#allocation7 + $0x160] sm:$0xff] %v738_v18  ;;  %1005 = vst [vmem:[#allocation7 + $0x1e0] sm:$0xff] %v977_v19  ;;  %v1319_v23 = vpop.f32.mrb[30].mxu0  ;;  %v1351_v24 = vpop.f32.mrb[30].mxu1  ;;  %v817_v26 = vadd.f32 %v816_v17, %v802_v15  ;;  %v780_v27 = vadd.f32 %v1315_v54, %v779_v16  ;;  %v804_v28 = vmul.f32 %v738_v18, %v738_v18 }
 0x156   :  { %769 = vst [vmem:[#allocation7 + $0x178] sm:$0xff] %v1319_v23  ;;  %1008 = vst [vmem:[#allocation7 + $0x1f8] sm:$0xff] %v1351_v24  ;;  %v741_v29 = vpop.f32.mrb[31].mxu0  ;;  %v980_v30 = vpop.f32.mrb[31].mxu1  ;;  %v1056_v32 = vadd.f32 %v1055_v22, %v1041_v20  ;;  %v1019_v33 = vadd.f32 %v1347_v55, %v1018_v21  ;;  %v1043_v34 = vmul.f32 %v977_v19, %v977_v19 }
 0x157   :  { %767 = vst [vmem:[#allocation7 + $0x168] sm:$0xff] %v741_v29  ;;  %1006 = vst [vmem:[#allocation7 + $0x1e8] sm:$0xff] %v980_v30  ;;  %v781_v35 = vadd.f32 %v780_v27, %v738_v18  ;;  %v818_v36 = vadd.f32 %v817_v26, %v803_v25  ;;  %v805_v37 = vmul.f32 %v741_v29, %v741_v29 }
 0x158   :  { %1457 = shalt.err (!%p1454_p6)
}
 0x159   :  { %s1458_s18 = scalar_lea.hbm %s1688_s2, 8192 }
 0x15a   :  { %p1459_p7 = scmp.ne.s32.totalorder %s1688_s2, %s1458_s18  ;;  %p1462_p8 = scmp.lt.u32.totalorder %s1458_s18, %s1688_s2 }
 0x15c   :  { %p1464_p9 = pnand %p1462_p8, %p1459_p7 }
 0x15e   :  { %1467 = shalt.err (!%p1464_p9)
}
 0x15f   :  { %s1526_s23 = smov 128   ;;  %s1527_s24 = smov 8   ;;  %v1020_v38 = vadd.f32 %v1019_v33, %v977_v19  ;;  %v1057_v39 = vadd.f32 %v1056_v32, %v1042_v31  ;;  %v1044_v40 = vmul.f32 %v980_v30, %v980_v30  ;;  %v819_v41 = vadd.f32 %v818_v36, %v804_v28  ;;  %v1069_v21 = vld [vmem:[#allocation8] sm:$0x1]  ;;  %v1072_v25 = vld [vmem:[#allocation10] sm:$0x1] }
 0x160   :  { %1086 = dma.vmem_to_hbm [thread:$0]  %s1633_s14, 8192, %s1688_s2, [#allocation4], %s1526_s23, %s1526_s23, %s1527_s24   ;;  %v782_v42 = vadd.f32 %v781_v35, %v741_v29  ;;  %v806_v47 = vmul.f32 %v1318_v13, %v1318_v13  ;;  %v1045_v49 = vmul.f32 %v1350_v14, %v1350_v14  ;;  %v807_v52 = vmul.f32 %v1319_v23, %v1319_v23 }
 0x161   :  { %v1058_v43 = vadd.f32 %v1057_v39, %v1043_v34  ;;  %v1021_v46 = vadd.f32 %v1020_v38, %v980_v30  ;;  %v820_v48 = vadd.f32 %v819_v41, %v805_v37  ;;  %v1046_v55 = vmul.f32 %v1351_v24, %v1351_v24  ;;  %s1528_s2 = smov [#allocation8]   ;;  %s1529_s28 = smov [#allocation10]  }
 0x162   :  { %v783_v44 = vadd.f32 %v1318_v13, %v782_v42  ;;  %s1093_s27 = sshll.u32 %s1528_s2, 4  ;;  %s1103_s29 = sshll.u32 %s1529_s28, 4  ;;  %s1094_s27 = int_to_ptr.vmem [resolvable:$true] %s1093_s27  ;;  %s1654_s29 = int_to_ptr.vmem [resolvable:$true] %s1103_s29 }
 0x163   :  { %v1022_v50 = vadd.f32 %v1350_v14, %v1021_v46  ;;  %v1059_v51 = vadd.f32 %v1058_v43, %v1044_v40  ;;  %v821_v54 = vadd.f32 %v820_v48, %v806_v47  ;;  %s1468_s30 = scalar_lea.vmem %s1094_s27, 16  ;;  %s1472_s5 = scalar_lea.vmem %s1094_s27, 32 }
 0x164   :  { %v784_v53 = vadd.f32 %v1319_v23, %v783_v44  ;;  %p1469_p10 = scmp.ne.s32.totalorder %s1094_s27, %s1468_s30  ;;  %p1473_p11 = scmp.lt.s32.totalorder %s1094_s27, %s1094_s27 }
 0x165   :  { %v1023_v56 = vadd.f32 %v1351_v24, %v1022_v50  ;;  %v1060_v57 = vadd.f32 %v1059_v51, %v1045_v49  ;;  %v822_v59 = vadd.f32 %v821_v54, %v807_v52  ;;  %p1474_p12 = scmp.lt.s32.totalorder %s1472_s5, %s1468_s30 }
 0x166   :  { %v785_v58 = vrot.slane %v784_v53, 4 }
 0x167   :  { %v1024_v60 = vrot.slane %v1023_v56, 4  ;;  %v1061_v61 = vadd.f32 %v1060_v57, %v1046_v55  ;;  %v823_v63 = vrot.slane %v822_v59, 4  ;;  %p1475_p13 = por %p1474_p12, %p1473_p11 }
 0x168   :  { %v786_v62 = vadd.f32 %v785_v58, %v784_v53 }
 0x169   :  { %v1025_v0 = vadd.f32 %v1024_v60, %v1023_v56  ;;  %v1062_v1 = vrot.slane %v1061_v61, 4  ;;  %v824_v3 = vadd.f32 %v823_v63, %v822_v59  ;;  %p1476_p0 = pnand %p1475_p13, %p1469_p10 }
 0x16a   :  { %v787_v2 = vrot.slane %v786_v62, 2 }
 0x16b   :  { %v1026_v4 = vrot.slane %v1025_v0, 2  ;;  %v1063_v6 = vadd.f32 %v1062_v1, %v1061_v61  ;;  %v825_v8 = vrot.slane %v824_v3, 2 }
 0x16c   :  { %v788_v7 = vadd.f32 %v787_v2, %v786_v62 }
 0x16d   :  { %v1027_v9 = vadd.f32 %v1026_v4, %v1025_v0  ;;  %v1064_v10 = vrot.slane %v1063_v6, 2  ;;  %v826_v12 = vadd.f32 %v825_v8, %v824_v3 }
 0x16e   :  { %v789_v11 = vrot.slane %v788_v7, 1 }
 0x16f   :  { %v1028_v13 = vrot.slane %v1027_v9, 1  ;;  %v1065_v14 = vadd.f32 %v1064_v10, %v1063_v6  ;;  %v827_v16 = vrot.slane %v826_v12, 1 }
 0x170   :  { %v790_v15 = vadd.f32 %v789_v11, %v788_v7 }
 0x171   :  { %v1066_v17 = vrot.slane %v1065_v14, 1  ;;  %v828_v18 = vadd.f32 %v827_v16, %v826_v12  ;;  %v1029_v20 = vadd.f32 %v1028_v13, %v1027_v9 }
 0x172   :  { %v791_v19 = vadd.f32 %v790_v15, %v1629_v45 }
 0x173   :  { %v829_v23 = vadd.f32 %v828_v18, %v1631_v5  ;;  %v1067_v24 = vadd.f32 %v1066_v17, %v1065_v14 }
 0x174   :  { %v1030_v22 = vadd.f32 %v1029_v20, %v791_v19 }
 0x175   :  { %v1068_v27 = vadd.f32 %v1067_v24, %v829_v23 }
 0x176   :  { %v1070_v26 = vadd.f32 %v1069_v21, %v1030_v22 }
 0x177   :  { %v1073_v28 = vadd.f32 %v1072_v25, %v1068_v27 }
 0x178   :  { %1071 = vst [vmem:[#allocation8] sm:$0x1] %v1070_v26 }
 0x179   :  { %1479 = shalt.err (!%p1476_p0)
}
 0x17a   :  { %s1480_s8 = scalar_lea.hbm %s1689_s3, 16 }
 0x17b   :  { %p1481_p1 = scmp.ne.s32.totalorder %s1689_s3, %s1480_s8  ;;  %p1484_p2 = scmp.lt.u32.totalorder %s1480_s8, %s1689_s3 }
 0x17d   :  { %p1486_p3 = pnand %p1484_p2, %p1481_p1 }
 0x17f   :  { %1489 = shalt.err (!%p1486_p3)
}
 0x180   :  { %1096 = dma.vmem_to_hbm [thread:$0]  %s1094_s27, 16, %s1689_s3, [#allocation9]   ;;  %1074 = vst [vmem:[#allocation10] sm:$0x1] %v1073_v28 }
 0x181   :  { %s1490_s1 = scalar_lea.vmem %s1654_s29, 16  ;;  %s1494_s14 = scalar_lea.vmem %s1654_s29, 32 }
 0x182   :  { %p1491_p4 = scmp.ne.s32.totalorder %s1654_s29, %s1490_s1  ;;  %p1495_p5 = scmp.lt.s32.totalorder %s1654_s29, %s1654_s29 }
 0x183   :  { %p1496_p6 = scmp.lt.s32.totalorder %s1494_s14, %s1490_s1 }
 0x185   :  { %p1497_p7 = por %p1496_p6, %p1495_p5 }
 0x187   :  { %p1498_p8 = pnand %p1497_p7, %p1491_p4 }
 0x189   :  { %1501 = shalt.err (!%p1498_p8)
}
 0x18a   :  { %s1502_s17 = scalar_lea.hbm %s1690_s4, 16 }
 0x18b   :  { %p1503_p9 = scmp.ne.s32.totalorder %s1690_s4, %s1502_s17  ;;  %p1506_p10 = scmp.lt.u32.totalorder %s1502_s17, %s1690_s4 }
 0x18d   :  { %p1508_p11 = pnand %p1506_p10, %p1503_p9 }
 0x18f   :  { %1511 = shalt.err (!%p1508_p11)
}
 0x190   :  { %1106 = dma.vmem_to_hbm [thread:$0]  %s1654_s29, 16, %s1690_s4, [#allocation9]  }
 0x191   :  { %1516 = dma.done.wait [#allocation4], 8192  }
 0x192   :  { %1517 = vsyncadd [#allocation4], 4294959104 }
 0x193   :  { %1518 = dma.done.wait [#allocation9], 32  }
 0x194   :  { %1519 = vsyncadd [#allocation9], 4294967264 }
 0x195   :  { %1116 = vsyncpa [#allocation3], 1 }
 0x196   :  { %1117 = vsyncpa [#allocation6], 1 }
 0x197   :  { %1118 = vsyncpa [#allocation4], 1 }
 0x198   :  { %1119 = vsyncpa [#allocation9], 1 }

</bundles_post_ra>
